<compile_context>
chip_gen: v5e
topology: v5e:2x2
jax: 0.10.0
libtpu: 0.0.40
codegen_flags: <defaults>
</compile_context>

<pallas_src>
import functools

import jax
import jax.numpy as jnp
from jax.experimental import pallas as pl
from jax.experimental.pallas import tpu as pltpu


def _round_up(x, m):
    return ((x + m - 1) // m) * m


def generate_base_anchors(stride, scales, ratios):
    """Same math as AnchorGenerator.generate_base_anchors (float32)."""
    scales = jnp.asarray(scales, dtype=jnp.float32)
    ratios = jnp.asarray(ratios, dtype=jnp.float32)
    h_ratios = jnp.sqrt(ratios)
    w_ratios = 1.0 / h_ratios
    ws = float(stride) * (w_ratios[:, None] * scales[None, :]).reshape(-1)
    hs = float(stride) * (h_ratios[:, None] * scales[None, :]).reshape(-1)
    # (A, 4) in (x_tl, y_tl, x_br, y_br) order
    return jnp.stack([-0.5 * ws, -0.5 * hs, 0.5 * ws, 0.5 * hs], axis=-1)


def _anchor_kernel(rowx_ref, ymask_ref, out_ref, *, rows_per_tile, stride):
    """One tile of (feature-map rows, w_feat*4*A) anchors.

    rowx_ref  : (1, W*C)  base anchors with per-column x-shift baked in
    ymask_ref : (1, W*C)  1.0 on y channels (y_tl, y_br), 0.0 on x channels
    out_ref   : (T, W*C)
    """
    tile = pl.program_id(0)
    # Global feature-map row index of every sublane row in this tile.
    row_local = jax.lax.broadcasted_iota(jnp.int32, (rows_per_tile, 1), 0)
    row_global = tile * rows_per_tile + row_local                      # (T, 1)
    shift_y = row_global.astype(jnp.float32) * jnp.float32(stride)    # (T, 1)
    # (1,WC) + (T,1)*(1,WC) -> (T,WC): one mul + one add per element (VALU).
    out_ref[...] = rowx_ref[...] + shift_y * ymask_ref[...]


def anchor_generator_forward(img_height, img_width, *, stride,
                             scales=(8.0, 16.0, 32.0), ratios=(0.5, 1.0, 2.0),
                             target_block_bytes=16 * 1024 * 1024):
    """Pallas equivalent of AnchorGenerator.forward. Returns (H*W*A, 4) float32."""
    base = generate_base_anchors(stride, scales, ratios)              # (A, 4)
    A = base.shape[0]
    C = 4 * A
    h_feat = -(-img_height // stride)      # == len(arange(0, H, stride))
    w_feat = -(-img_width // stride)
    WC = w_feat * C

    # --- tiny precompute in plain JAX (scalar-ish work) --------------------
    # Lane row: base[a, k] + col*stride on x channels (k = 0, 2).
    shifts_x = jnp.arange(w_feat, dtype=jnp.float32) * float(stride)  # (w_feat,)
    x_mask4 = jnp.array([1.0, 0.0, 1.0, 0.0], dtype=jnp.float32)
    y_mask4 = jnp.array([0.0, 1.0, 0.0, 1.0], dtype=jnp.float32)
    row_x = (base[None, :, :] +
             shifts_x[:, None, None] * x_mask4[None, None, :]).reshape(1, WC)
    y_mask = jnp.broadcast_to(y_mask4, (w_feat * A, 4)).reshape(1, WC)

    # --- tile sizing: large lane-dense blocks, multiple of 8 sublanes ------
    row_bytes = WC * 4
    rows_cap = max(8, (target_block_bytes // row_bytes) // 8 * 8)
    if h_feat <= 8:
        # Tiny feature map: single block equal to the full row extent
        # (block dim == full array dim is always a legal layout).
        rows_per_tile = h_feat
    else:
        rows_per_tile = min(rows_cap, _round_up(h_feat, 8))
        if rows_per_tile >= h_feat:
            # Guarantee >= 2 grid steps so v7x's second TensorCore gets work.
            rows_per_tile = max(8, _round_up(-(-h_feat // 2), 8))
    grid = (pl.cdiv(h_feat, rows_per_tile),)

    kernel = functools.partial(_anchor_kernel,
                               rows_per_tile=rows_per_tile,
                               stride=float(stride))

    slab = pl.pallas_call(
        kernel,
        out_shape=jax.ShapeDtypeStruct((h_feat, WC), jnp.float32),
        grid_spec=pltpu.PrefetchScalarGridSpec(
            num_scalar_prefetch=0,
            grid=grid,
            in_specs=[
                pl.BlockSpec((1, WC), lambda i: (0, 0)),             # row_x
                pl.BlockSpec((1, WC), lambda i: (0, 0)),             # y_mask
            ],
            out_specs=pl.BlockSpec((rows_per_tile, WC), lambda i: (i, 0)),
        ),
        compiler_params=pltpu.CompilerParams(
            dimension_semantics=("parallel",),
            vmem_limit_bytes=48 * 1024 * 1024),
    )(row_x, y_mask)

    # Pure view: (h_feat, w_feat*A*4) -> (H*W*A, 4), same row-major bytes.
    return slab.reshape(h_feat * w_feat * A, 4)


def _reference_forward(img_height, img_width, *, stride,
                       scales=(8.0, 16.0, 32.0), ratios=(0.5, 1.0, 2.0)):
    """Pure-JAX reference mirroring the PyTorch forward."""
    base = generate_base_anchors(stride, scales, ratios)              # (A, 4)
    shifts_x = jnp.arange(0, img_width, stride, dtype=jnp.float32)
    shifts_y = jnp.arange(0, img_height, stride, dtype=jnp.float32)
    shift_y, shift_x = jnp.meshgrid(shifts_y, shifts_x, indexing="ij")
    shift_x = shift_x.reshape(-1)
    shift_y = shift_y.reshape(-1)
    shifts = jnp.stack((shift_x, shift_y, shift_x, shift_y), axis=1)
    anchors = base[None, :, :] + shifts[:, None, :]
    return anchors.reshape(-1, 4)


if __name__ == "__main__":
    # Forward only takes image height/width (ints); PRNG kept for convention.
    key = jax.random.PRNGKey(0)
    del key

    stride = 4

    # Small case: 16x16 image -> 4x4 feature map, 9 base anchors (single block).
    out = anchor_generator_forward(16, 16, stride=stride)
    out = jax.block_until_ready(out)
    ref = _reference_forward(16, 16, stride=stride)
    assert out.shape == ref.shape == (144, 4), (out.shape, ref.shape)
    assert jnp.allclose(out, ref, atol=1e-5, rtol=1e-5), "mismatch (small)"

    # Multi-tile case: tiny block-size cap forces grid > 1 to exercise the
    # pipelined multi-step path.
    out2 = anchor_generator_forward(64, 64, stride=stride,
                                    target_block_bytes=8192)
    out2 = jax.block_until_ready(out2)
    ref2 = _reference_forward(64, 64, stride=stride)
    assert out2.shape == ref2.shape == (16 * 16 * 9, 4), (out2.shape, ref2.shape)
    assert jnp.allclose(out2, ref2, atol=1e-5, rtol=1e-5), "mismatch (multi-tile)"

    # Ragged case: h_feat = 18 with 8-row tiles -> last block only 2 valid rows
    # (exercises the masked ragged-tail writeback, no padded rows in output).
    out3 = anchor_generator_forward(72, 48, stride=stride,
                                    target_block_bytes=8192)
    out3 = jax.block_until_ready(out3)
    ref3 = _reference_forward(72, 48, stride=stride)
    assert out3.shape == ref3.shape == (18 * 12 * 9, 4), (out3.shape, ref3.shape)
    assert jnp.allclose(out3, ref3, atol=1e-5, rtol=1e-5), "mismatch (ragged)"

    print("KERNEL_OK")
</pallas_src>

<mosaic_0001>
module attributes {stable_mosaic.version = 11 : i64} {
  func.func @_anchor_kernel(%arg0: i32, %arg1: memref<1x144xf32, #tpu.memory_space<vmem>>, %arg2: memref<1x144xf32, #tpu.memory_space<vmem>>, %arg3: memref<4x144xf32, #tpu.memory_space<vmem>>) attributes {dimension_semantics = [#tpu.dimension_semantics<parallel>], iteration_bounds = array<i64: 1>, scalar_prefetch = 0 : i64, scratch_operands = 0 : i64, tpu.core_type = #tpu.core_type<tc>, window_params = [{pipeline_mode = #tpu.pipeline_mode<synchronous>, transform_indices = @transform_0, window_bounds = array<i64: 1, 144>}, {pipeline_mode = #tpu.pipeline_mode<synchronous>, transform_indices = @transform_1, window_bounds = array<i64: 1, 144>}, {transform_indices = @transform_2, window_bounds = array<i64: 4, 144>}]} {
    %0 = tpu.iota {dimensions = array<i32: 0>} : vector<4x1xi32>
    %c4_i32 = arith.constant 4 : i32
    %1 = arith.muli %arg0, %c4_i32 : i32
    %2 = vector.broadcast %1 : i32 to vector<4x1xi32>
    %3 = arith.addi %2, %0 : vector<4x1xi32>
    %4 = arith.sitofp %3 : vector<4x1xi32> to vector<4x1xf32>
    %cst = arith.constant 4.000000e+00 : f32
    %5 = vector.broadcast %cst : f32 to vector<4x1xf32>
    %6 = arith.mulf %4, %5 : vector<4x1xf32>
    %c0 = arith.constant 0 : index
    %c0_0 = arith.constant 0 : index
    %7 = vector.load %arg1[%c0, %c0_0] : memref<1x144xf32, #tpu.memory_space<vmem>>, vector<1x144xf32>
    %c0_1 = arith.constant 0 : index
    %c0_2 = arith.constant 0 : index
    %8 = vector.load %arg2[%c0_1, %c0_2] : memref<1x144xf32, #tpu.memory_space<vmem>>, vector<1x144xf32>
    %9 = vector.broadcast %6 : vector<4x1xf32> to vector<4x144xf32>
    %10 = vector.broadcast %8 : vector<1x144xf32> to vector<4x144xf32>
    %11 = arith.mulf %9, %10 : vector<4x144xf32>
    %12 = vector.broadcast %7 : vector<1x144xf32> to vector<4x144xf32>
    %13 = arith.addf %12, %11 : vector<4x144xf32>
    %c0_3 = arith.constant 0 : index
    %c0_4 = arith.constant 0 : index
    %14 = vector.load %arg3[%c0_3, %c0_4] : memref<4x144xf32, #tpu.memory_space<vmem>>, vector<4x144xf32>
    tpu.vector_store %arg3[%c0_3, %c0_4], %13 {strides = array<i32>} : memref<4x144xf32, #tpu.memory_space<vmem>>, vector<4x144xf32>,
    return
  }
  func.func @transform_0(%arg0: i32) -> (i32, i32) {
    %c0_i32 = arith.constant 0 : i32
    %c0_i32_0 = arith.constant 0 : i32
    %c0_i32_1 = arith.constant 0 : i32
    return %c0_i32, %c0_i32_0 : i32, i32
  }
  func.func @transform_1(%arg0: i32) -> (i32, i32) {
    %c0_i32 = arith.constant 0 : i32
    %c0_i32_0 = arith.constant 0 : i32
    %c0_i32_1 = arith.constant 0 : i32
    return %c0_i32, %c0_i32_0 : i32, i32
  }
  func.func @transform_2(%arg0: i32) -> (i32, i32) {
    %c0_i32 = arith.constant 0 : i32
    %c0_i32_0 = arith.constant 0 : i32
    return %arg0, %c0_i32 : i32, i32
  }
}

</mosaic_0001>

<bundles_post_ra>
// kernel: tpu_custom_call.1
= control target key start
LH: loop header
LB: loop body
LE: loop exit
PB: predicated region body
PF: predicated region fallthrough
CT: control target
= control target key end

     0   :  { %7 = vsyncpa [#allocation3], 0  ;;  %s198_s0 = inlined_call_operand.hbm [shape: f32[1,144], index: 0, kind: input, shape index: {}]   ;;  %s199_s1 = inlined_call_operand.hbm [shape: f32[1,144], index: 1, kind: input, shape index: {}]   ;;  %s200_s2 = inlined_call_operand.hbm [shape: f32[4,144], index: 2, kind: output, shape index: {}]  }
   0x1   :  { %8 = vsyncpa [#allocation6], 0 }
   0x2   :  { %9 = vsyncpa [#allocation4], 0  ;;  %s15_s11 = sshll.u32 %s198_s0, 4  ;;  %s171_s12 = smov [#allocation2]   ;;  %s16_s11 = int_to_ptr.hbm [resolvable:$true] %s15_s11 }
   0x3   :  { %s17_s13 = sshll.u32 %s171_s12, 4  ;;  %s26_s16 = sshll.u32 %s199_s1, 4  ;;  %s18_s13 = int_to_ptr.vmem [resolvable:$true] %s17_s13  ;;  %s27_s16 = int_to_ptr.hbm [resolvable:$true] %s26_s16 }
   0x4   :  { %20 = dma.hbm_to_vmem [thread:$0]  %s16_s11, 32, %s18_s13, [#allocation3]  }
   0x5   :  { %s172_s17 = smov [#allocation5]  }
   0x6   :  { %s28_s18 = sshll.u32 %s172_s17, 4  ;;  %s29_s18 = int_to_ptr.vmem [resolvable:$true] %s28_s18 }
   0x7   :  { %31 = dma.hbm_to_vmem [thread:$0]  %s27_s16, 32, %s29_s18, [#allocation6]  }
   0x8   :  { %165 = dma.done.wait [#allocation3], 32  }
   0x9   :  { %166 = vsyncadd [#allocation3], 4294967264 }
   0xa   :  { %167 = dma.done.wait [#allocation6], 32  }
   0xb   :  { %168 = vsyncadd [#allocation6], 4294967264  ;;  %v40_v0 = vlaneseq  ;;  %v47_v4 = vld [vmem:[#allocation2] sm:$0x3]  ;;  %v48_v5 = vld [vmem:[#allocation5] sm:$0x3] }
   0xc   :  { %v50_v6 = vperm.slane %v48_v5, 0  ;;  %v51_v7 = vperm.slane %v48_v5, 1  ;;  %v57_v8 = vperm.slane %v47_v4, 0  ;;  %v58_v9 = vperm.slane %v47_v4, 1  ;;  %s173_s0 = smov [#allocation7]   ;;  %s79_s21 = sshll.u32 %s200_s2, 4  ;;  %s80_s21 = int_to_ptr.hbm [resolvable:$true] %s79_s21 }
   0xd   :  { %v41_v1 = vshrl.u32 %v40_v0, 7  ;;  %vm66_vm0 = vcmask 1043456   ;;  %vm69_vm1 = vcmask 130052   ;;  %s77_s1 = sshll.u32 %s173_s0, 4  ;;  %s78_s1 = int_to_ptr.vmem [resolvable:$true] %s77_s1 }
   0xe   :  { %vm70_vm2 = vmor %vm69_vm1, %vm66_vm0 }
   0xf   :  { %v45_v2 = vcvt.s32.f32 %v41_v1 }
  0x11   :  { %v46_v3 = vmul.f32 4.0, %v45_v2 }
  0x13   :  { %v54_v10 = vmul.f32 %v50_v6, %v46_v3  ;;  %v55_v11 = vmul.f32 %v51_v7, %v46_v3 }
  0x15   :  { %v61_v12 = vadd.f32 %v57_v8, %v54_v10  ;;  %v62_v13 = vadd.f32 %v58_v9, %v55_v11 }
  0x17   :  { %v65_v14 = vrot.slane %v62_v13, 4 }
  0x19   :  { %v67_v15 = vsel %vm66_vm0, %v61_v12, %v65_v14 }
  0x1a   :  { %71 = vst.msk [vmem:[#allocation7] sm:$0xff] %vm70_vm2, %v67_v15 }
  0x1b   :  { %82 = dma.vmem_to_hbm [thread:$0]  %s78_s1, 128, %s80_s21, [#allocation4]  }
  0x1c   :  { %169 = dma.done.wait [#allocation4], 128  }
  0x1d   :  { %170 = vsyncadd [#allocation4], 4294967168 }
  0x1e   :  { %87 = vsyncpa [#allocation3], 1 }
  0x1f   :  { %88 = vsyncpa [#allocation6], 1 }
  0x20   :  { %89 = vsyncpa [#allocation4], 1 }

</bundles_post_ra>
